<compile_context>
chip_gen: v5e
topology: v5e:2x2
jax: 0.10.0
libtpu: 0.0.40
codegen_flags: <defaults>
</compile_context>

<pallas_src>
import functools

import jax
import jax.numpy as jnp
from jax.experimental import pallas as pl
from jax.experimental.pallas import tpu as pltpu

HIDDEN_SIZE = 128
VALUE_LANE = 128          # lane granularity for the padded value-head weight columns
VPU_L1_MAX_STATE = 32     # use the VPU broadcast-MAC path for layer 1 up to this state dim


def _round_up(x, m):
    return pl.cdiv(x, m) * m


# --------------------------------------------------------------------------- #
# Kernel
# --------------------------------------------------------------------------- #
def _qnet_kernel(x_ref, w1_ref, w23_ref, b_ref, out_ref, *,
                 state_size, action_size, l1_on_vpu):
    """One batch tile of the fused 3-layer MLP.

    x_ref   : (tb, state_size)  f32      state tile (unpadded)
    w1_ref  : (s8, 128)         f32      layer-1 weight rows (VPU path)
    w23_ref : (256, N)          f32/bf16 packed [w2 ; w3_padded], N = round_up(A,128)
    b_ref   : (8, N)            f32      rows 0/1/2 = b1 / b2 / b3_padded
    out_ref : (tb, action_size) f32      compact Q-values
    """
    H = HIDDEN_SIZE
    wdt = w23_ref.dtype

    x = x_ref[...]                 # (tb, S) f32
    b1 = b_ref[0:1, 0:H]           # (1, H) f32
    b2 = b_ref[1:2, 0:H]
    b3 = b_ref[2:3, :]             # (1, N)

    # ---- Layer 1 ----------------------------------------------------------
    if l1_on_vpu:
        # VPU/XLU path: sum_k x[:,k] (lane-broadcast) * w1[k,:], f32 accumulate.
        # Avoids burning a full MXU K-tile on a K=state_size contraction.
        acc = x[:, 0:1] * w1_ref[0:1, :]
        for k in range(1, state_size):
            acc = acc + x[:, k:k + 1] * w1_ref[k:k + 1, :]
        h1 = jnp.maximum(acc + b1, 0.0)
    else:
        # Fallback for large state dims: ordinary MXU matmul (f32 weights).
        w1 = w1_ref[0:state_size, :]
        h1 = jnp.maximum(
            jnp.dot(x, w1, preferred_element_type=jnp.float32) + b1, 0.0)

    # ---- Layer 2 (MXU) -----------------------------------------------------
    w2 = w23_ref[0:H, 0:H]                                   # (H, H), tile-aligned slice
    h2 = jnp.dot(h1.astype(wdt), w2, preferred_element_type=jnp.float32) + b2
    h2 = jnp.maximum(h2, 0.0)                                # f32 elementwise (v5e-safe)

    # ---- Layer 3 / value head (MXU) ---------------------------------------
    w3 = w23_ref[H:2 * H, :]                                 # (H, N), tile-aligned slice
    v = jnp.dot(h2.astype(wdt), w3, preferred_element_type=jnp.float32) + b3

    # Compact store: only the real action columns go to HBM.
    out_ref[...] = v[:, 0:action_size].astype(out_ref.dtype)


# --------------------------------------------------------------------------- #
# Parameter packing / wrapper
# --------------------------------------------------------------------------- #
def pack_qnet_params(params, state_size, weight_dtype=jnp.bfloat16):
    """Pack parameters for the kernel.

    w1  : (round_up(S,8), 128) f32   -- consumed row-by-row on the VPU
    w23 : (256, N)         weight_dtype, N = round_up(A,128); segments at rows 0/128
    b   : (8, N)           f32       rows 0/1/2 = b1/b2/b3 (zero-padded columns)
    """
    H = HIDDEN_SIZE
    A = params["w3"].shape[1]
    N = _round_up(A, VALUE_LANE)
    s8 = _round_up(max(state_size, 1), 8)

    w1 = jnp.zeros((s8, H), jnp.float32).at[:state_size, :].set(
        params["w1"].astype(jnp.float32))
    w2p = jnp.zeros((H, N), jnp.float32).at[:, :H].set(params["w2"].astype(jnp.float32))
    w3p = jnp.zeros((H, N), jnp.float32).at[:, :A].set(params["w3"].astype(jnp.float32))
    w23 = jnp.concatenate([w2p, w3p], axis=0).astype(weight_dtype)   # (2H, N)

    b = jnp.zeros((8, N), jnp.float32)
    b = b.at[0, :H].set(params["b1"].reshape(-1).astype(jnp.float32))
    b = b.at[1, :H].set(params["b2"].reshape(-1).astype(jnp.float32))
    b = b.at[2, :A].set(params["b3"].reshape(-1).astype(jnp.float32))

    return {"w1": w1, "w23": w23, "b": b,
            "state_size": state_size, "action_size": A}


def qnet_forward(state, packed, *, tile_b=1024):
    """state: (B, state_size) f32. Returns (B, action_size) f32 Q-values."""
    B, S = state.shape
    assert S == packed["state_size"]
    A = packed["action_size"]
    H = HIDDEN_SIZE
    w1, w23, b = packed["w1"], packed["w23"], packed["b"]
    N = w23.shape[1]

    # Batch tiling: multiple of 8, no tile-multiple padding (ragged last block is
    # masked by Pallas).  For large single-tile batches, halve the tile so the
    # ("parallel",) grid has >= 2 tiles and can split across v7x's 2 TensorCores.
    b8 = _round_up(B, 8)
    if B <= 8:
        tb = B                                   # single full-extent block
    else:
        tb = min(int(tile_b), b8)
        if b8 >= 128 and b8 <= tb:
            tb = _round_up(pl.cdiv(b8, 2), 8)
    n_tiles = pl.cdiv(B, tb)

    x = state.astype(jnp.float32)

    cost = pl.CostEstimate(
        flops=2 * B * (S * H + H * H + H * A),
        transcendentals=0,
        bytes_accessed=(x.size * 4 + B * A * 4
                        + w1.size * w1.dtype.itemsize
                        + w23.size * w23.dtype.itemsize
                        + b.size * 4),
    )

    kern = functools.partial(
        _qnet_kernel,
        state_size=S,
        action_size=A,
        l1_on_vpu=(S <= VPU_L1_MAX_STATE),
    )

    out = pl.pallas_call(
        kern,
        out_shape=jax.ShapeDtypeStruct((B, A), jnp.float32),
        grid=(n_tiles,),
        in_specs=[
            pl.BlockSpec((tb, S), lambda i: (i, 0)),           # state: streamed per tile
            pl.BlockSpec((w1.shape[0], H), lambda i: (0, 0)),  # w1 (f32): resident
            pl.BlockSpec((2 * H, N), lambda i: (0, 0)),        # packed w2|w3: resident
            pl.BlockSpec((8, N), lambda i: (0, 0)),            # biases: resident
        ],
        out_specs=pl.BlockSpec((tb, A), lambda i: (i, 0)),     # compact Q-value store
        compiler_params=pltpu.CompilerParams(
            dimension_semantics=("parallel",),                 # batch tiles are independent
        ),
        cost_estimate=cost,
    )(x, w1, w23, b)

    return out


# --------------------------------------------------------------------------- #
# Init + reference
# --------------------------------------------------------------------------- #
def init_qnet_params(key, state_size, action_size):
    """PyTorch nn.Linear default init (U[-1/sqrt(fan_in), 1/sqrt(fan_in)]).
    Weights stored as (in_features, out_features)."""
    ks = jax.random.split(key, 6)

    def linear(kw, kb, fan_in, fan_out):
        bound = 1.0 / jnp.sqrt(jnp.float32(fan_in))
        w = jax.random.uniform(kw, (fan_in, fan_out), jnp.float32, -bound, bound)
        bb = jax.random.uniform(kb, (fan_out,), jnp.float32, -bound, bound)
        return w, bb

    w1, b1 = linear(ks[0], ks[1], state_size, HIDDEN_SIZE)
    w2, b2 = linear(ks[2], ks[3], HIDDEN_SIZE, HIDDEN_SIZE)
    w3, b3 = linear(ks[4], ks[5], HIDDEN_SIZE, action_size)
    return {"w1": w1, "b1": b1, "w2": w2, "b2": b2, "w3": w3, "b3": b3}


def qnet_reference(state, params, weight_dtype=jnp.float32):
    """Pure-JAX reference mirroring the kernel's numerics: layer 1 in f32,
    layers 2/3 dot inputs cast to weight_dtype, f32 accumulation / bias / ReLU."""
    x = state.astype(jnp.float32)
    h1 = jnp.maximum(
        jnp.dot(x, params["w1"].astype(jnp.float32),
                preferred_element_type=jnp.float32) + params["b1"].reshape(1, -1), 0.0)
    h2 = jnp.maximum(
        jnp.dot(h1.astype(weight_dtype), params["w2"].astype(weight_dtype),
                preferred_element_type=jnp.float32) + params["b2"].reshape(1, -1), 0.0)
    return (jnp.dot(h2.astype(weight_dtype), params["w3"].astype(weight_dtype),
                    preferred_element_type=jnp.float32)
            + params["b3"].reshape(1, -1))


# --------------------------------------------------------------------------- #
# Demo / correctness check
# --------------------------------------------------------------------------- #
if __name__ == "__main__":
    key = jax.random.PRNGKey(0)
    k_params, k_state, k_big = jax.random.split(key, 3)

    state_size = 4     # e.g. CartPole observation dim
    action_size = 2    # e.g. CartPole action dim

    params = init_qnet_params(k_params, state_size, action_size)

    # --- 1) tiny inference-style batch, f32 weights (tight tolerance) ---
    state = jax.random.normal(k_state, (2, state_size), dtype=jnp.float32)
    packed_f32 = pack_qnet_params(params, state_size, weight_dtype=jnp.float32)
    out_f32 = jax.block_until_ready(qnet_forward(state, packed_f32))
    ref_f32 = qnet_reference(state, params, jnp.float32)
    assert out_f32.shape == (2, action_size)
    assert jnp.allclose(out_f32, ref_f32, atol=1e-5, rtol=1e-5)

    # --- 2) larger ragged batch, bf16 weights, 2-tile grid (exercises the
    #        masked partial last tile and the >=2-tile TensorCore split) ---
    big_state = jax.random.normal(k_big, (300, state_size), dtype=jnp.float32)
    packed_bf16 = pack_qnet_params(params, state_size, weight_dtype=jnp.bfloat16)
    out_bf16 = jax.block_until_ready(qnet_forward(big_state, packed_bf16))
    ref_bf16 = qnet_reference(big_state, params, jnp.bfloat16)
    assert out_bf16.shape == (300, action_size)
    assert jnp.allclose(out_bf16, ref_bf16, atol=3e-3, rtol=3e-3)

    print("KERNEL_OK")
</pallas_src>

<mosaic_0001>
module attributes {stable_mosaic.version = 11 : i64} {
  func.func @_qnet_kernel(%arg0: i32, %arg1: memref<2x4xf32, #tpu.memory_space<vmem>>, %arg2: memref<8x128xf32, #tpu.memory_space<vmem>>, %arg3: memref<256x128xf32, #tpu.memory_space<vmem>>, %arg4: memref<8x128xf32, #tpu.memory_space<vmem>>, %arg5: memref<2x2xf32, #tpu.memory_space<vmem>>) attributes {dimension_semantics = [#tpu.dimension_semantics<parallel>], iteration_bounds = array<i64: 1>, scalar_prefetch = 0 : i64, scratch_operands = 0 : i64, tpu.core_type = #tpu.core_type<tc>, window_params = [{transform_indices = @transform_0, window_bounds = array<i64: 2, 4>}, {pipeline_mode = #tpu.pipeline_mode<synchronous>, transform_indices = @transform_1, window_bounds = array<i64: 8, 128>}, {pipeline_mode = #tpu.pipeline_mode<synchronous>, transform_indices = @transform_2, window_bounds = array<i64: 256, 128>}, {pipeline_mode = #tpu.pipeline_mode<synchronous>, transform_indices = @transform_3, window_bounds = array<i64: 8, 128>}, {transform_indices = @transform_4, window_bounds = array<i64: 2, 2>}]} {
    %c0 = arith.constant 0 : index
    %c0_0 = arith.constant 0 : index
    %0 = vector.load %arg1[%c0, %c0_0] : memref<2x4xf32, #tpu.memory_space<vmem>>, vector<2x4xf32>
    %c0_1 = arith.constant 0 : index
    %c0_2 = arith.constant 0 : index
    %1 = vector.load %arg4[%c0_1, %c0_2] : memref<8x128xf32, #tpu.memory_space<vmem>>, vector<1x128xf32>
    %c1 = arith.constant 1 : index
    %c0_3 = arith.constant 0 : index
    %2 = vector.load %arg4[%c1, %c0_3] : memref<8x128xf32, #tpu.memory_space<vmem>>, vector<1x128xf32>
    %c2 = arith.constant 2 : index
    %c0_4 = arith.constant 0 : index
    %3 = vector.load %arg4[%c2, %c0_4] : memref<8x128xf32, #tpu.memory_space<vmem>>, vector<1x128xf32>
    %4 = vector.extract_strided_slice %0 {offsets = [0, 0], sizes = [2, 1], strides = [1, 1]} : vector<2x4xf32> to vector<2x1xf32>
    %c0_5 = arith.constant 0 : index
    %c0_6 = arith.constant 0 : index
    %5 = vector.load %arg2[%c0_5, %c0_6] : memref<8x128xf32, #tpu.memory_space<vmem>>, vector<1x128xf32>
    %6 = vector.broadcast %4 : vector<2x1xf32> to vector<2x128xf32>
    %7 = vector.broadcast %5 : vector<1x128xf32> to vector<2x128xf32>
    %8 = arith.mulf %6, %7 : vector<2x128xf32>
    %9 = vector.extract_strided_slice %0 {offsets = [0, 1], sizes = [2, 1], strides = [1, 1]} : vector<2x4xf32> to vector<2x1xf32>
    %c1_7 = arith.constant 1 : index
    %c0_8 = arith.constant 0 : index
    %10 = vector.load %arg2[%c1_7, %c0_8] : memref<8x128xf32, #tpu.memory_space<vmem>>, vector<1x128xf32>
    %11 = vector.broadcast %9 : vector<2x1xf32> to vector<2x128xf32>
    %12 = vector.broadcast %10 : vector<1x128xf32> to vector<2x128xf32>
    %13 = arith.mulf %11, %12 : vector<2x128xf32>
    %14 = arith.addf %8, %13 : vector<2x128xf32>
    %15 = vector.extract_strided_slice %0 {offsets = [0, 2], sizes = [2, 1], strides = [1, 1]} : vector<2x4xf32> to vector<2x1xf32>
    %c2_9 = arith.constant 2 : index
    %c0_10 = arith.constant 0 : index
    %16 = vector.load %arg2[%c2_9, %c0_10] : memref<8x128xf32, #tpu.memory_space<vmem>>, vector<1x128xf32>
    %17 = vector.broadcast %15 : vector<2x1xf32> to vector<2x128xf32>
    %18 = vector.broadcast %16 : vector<1x128xf32> to vector<2x128xf32>
    %19 = arith.mulf %17, %18 : vector<2x128xf32>
    %20 = arith.addf %14, %19 : vector<2x128xf32>
    %21 = vector.extract_strided_slice %0 {offsets = [0, 3], sizes = [2, 1], strides = [1, 1]} : vector<2x4xf32> to vector<2x1xf32>
    %c3 = arith.constant 3 : index
    %c0_11 = arith.constant 0 : index
    %22 = vector.load %arg2[%c3, %c0_11] : memref<8x128xf32, #tpu.memory_space<vmem>>, vector<1x128xf32>
    %23 = vector.broadcast %21 : vector<2x1xf32> to vector<2x128xf32>
    %24 = vector.broadcast %22 : vector<1x128xf32> to vector<2x128xf32>
    %25 = arith.mulf %23, %24 : vector<2x128xf32>
    %26 = arith.addf %20, %25 : vector<2x128xf32>
    %27 = vector.broadcast %1 : vector<1x128xf32> to vector<2x128xf32>
    %28 = arith.addf %26, %27 : vector<2x128xf32>
    %cst = arith.constant 0.000000e+00 : f32
    %29 = vector.broadcast %cst : f32 to vector<2x128xf32>
    %30 = arith.maximumf %28, %29 : vector<2x128xf32>
    %c0_12 = arith.constant 0 : index
    %c0_13 = arith.constant 0 : index
    %31 = vector.load %arg3[%c0_12, %c0_13] : memref<256x128xf32, #tpu.memory_space<vmem>>, vector<128x128xf32>
    %cst_14 = arith.constant dense<0.000000e+00> : vector<2x128xf32>
    %32 = tpu.matmul %30, %31, %cst_14 {dimension_numbers = #tpu.dot_dimension_numbers<[1], [0], [0], [1], [0, 0, 1, 1], [], []>} : vector<2x128xf32>, vector<128x128xf32>, vector<2x128xf32> -> vector<2x128xf32>
    %33 = vector.broadcast %2 : vector<1x128xf32> to vector<2x128xf32>
    %34 = arith.addf %32, %33 : vector<2x128xf32>
    %cst_15 = arith.constant 0.000000e+00 : f32
    %35 = vector.broadcast %cst_15 : f32 to vector<2x128xf32>
    %36 = arith.maximumf %34, %35 : vector<2x128xf32>
    %c128 = arith.constant 128 : index
    %c0_16 = arith.constant 0 : index
    %37 = vector.load %arg3[%c128, %c0_16] : memref<256x128xf32, #tpu.memory_space<vmem>>, vector<128x128xf32>
    %cst_17 = arith.constant dense<0.000000e+00> : vector<2x128xf32>
    %38 = tpu.matmul %36, %37, %cst_17 {dimension_numbers = #tpu.dot_dimension_numbers<[1], [0], [0], [1], [0, 0, 1, 1], [], []>} : vector<2x128xf32>, vector<128x128xf32>, vector<2x128xf32> -> vector<2x128xf32>
    %39 = vector.broadcast %3 : vector<1x128xf32> to vector<2x128xf32>
    %40 = arith.addf %38, %39 : vector<2x128xf32>
    %41 = vector.extract_strided_slice %40 {offsets = [0, 0], sizes = [2, 2], strides = [1, 1]} : vector<2x128xf32> to vector<2x2xf32>
    %c0_18 = arith.constant 0 : index
    %c0_19 = arith.constant 0 : index
    %42 = vector.load %arg5[%c0_18, %c0_19] : memref<2x2xf32, #tpu.memory_space<vmem>>, vector<2x2xf32>
    tpu.vector_store %arg5[%c0_18, %c0_19], %41 {strides = array<i32>} : memref<2x2xf32, #tpu.memory_space<vmem>>, vector<2x2xf32>,
    return
  }
  func.func @transform_0(%arg0: i32) -> (i32, i32) {
    %c0_i32 = arith.constant 0 : i32
    %c0_i32_0 = arith.constant 0 : i32
    return %arg0, %c0_i32 : i32, i32
  }
  func.func @transform_1(%arg0: i32) -> (i32, i32) {
    %c0_i32 = arith.constant 0 : i32
    %c0_i32_0 = arith.constant 0 : i32
    %c0_i32_1 = arith.constant 0 : i32
    return %c0_i32, %c0_i32_0 : i32, i32
  }
  func.func @transform_2(%arg0: i32) -> (i32, i32) {
    %c0_i32 = arith.constant 0 : i32
    %c0_i32_0 = arith.constant 0 : i32
    %c0_i32_1 = arith.constant 0 : i32
    return %c0_i32, %c0_i32_0 : i32, i32
  }
  func.func @transform_3(%arg0: i32) -> (i32, i32) {
    %c0_i32 = arith.constant 0 : i32
    %c0_i32_0 = arith.constant 0 : i32
    %c0_i32_1 = arith.constant 0 : i32
    return %c0_i32, %c0_i32_0 : i32, i32
  }
  func.func @transform_4(%arg0: i32) -> (i32, i32) {
    %c0_i32 = arith.constant 0 : i32
    %c0_i32_0 = arith.constant 0 : i32
    return %arg0, %c0_i32 : i32, i32
  }
}

</mosaic_0001>

<bundles_post_ra>
// kernel: tpu_custom_call.1
= control target key start
LH: loop header
LB: loop body
LE: loop exit
PB: predicated region body
PF: predicated region fallthrough
CT: control target
= control target key end

     0   :  { %9 = vsyncpa [#allocation3], 0  ;;  %s412_s0 = inlined_call_operand.hbm [shape: f32[2,4], index: 0, kind: input, shape index: {}]   ;;  %s413_s1 = inlined_call_operand.hbm [shape: f32[8,128], index: 1, kind: input, shape index: {}]   ;;  %s414_s2 = inlined_call_operand.hbm [shape: f32[256,128], index: 2, kind: input, shape index: {}]   ;;  %s415_s3 = inlined_call_operand.hbm [shape: f32[8,128], index: 3, kind: input, shape index: {}]   ;;  %s416_s4 = inlined_call_operand.hbm [shape: f32[2,2], index: 4, kind: output, shape index: {}]  }
   0x1   :  { %10 = vsyncpa [#allocation6], 0 }
   0x2   :  { %11 = vsyncpa [#allocation9], 0  ;;  %s29_s17 = sshll.u32 %s413_s1, 4  ;;  %s30_s17 = int_to_ptr.hbm [resolvable:$true] %s29_s17 }
   0x3   :  { %12 = vsyncpa [#allocation4], 0  ;;  %s361_s18 = smov [#allocation5]   ;;  %s18_s22 = sshll.u32 %s412_s0, 4  ;;  %s19_s22 = int_to_ptr.hbm [resolvable:$true] %s18_s22 }
   0x4   :  { %s31_s19 = sshll.u32 %s361_s18, 4  ;;  %s362_s23 = smov [#allocation2]   ;;  %s32_s19 = int_to_ptr.vmem [resolvable:$true] %s31_s19 }
   0x5   :  { %34 = dma.hbm_to_vmem [thread:$0]  %s30_s17, 128, %s32_s19, [#allocation6]  }
   0x6   :  { %s20_s24 = sshll.u32 %s362_s23, 4  ;;  %s39_s27 = sshll.u32 %s414_s2, 4  ;;  %s21_s24 = int_to_ptr.vmem [resolvable:$true] %s20_s24  ;;  %s40_s27 = int_to_ptr.hbm [resolvable:$true] %s39_s27 }
   0x7   :  { %23 = dma.hbm_to_vmem [thread:$0]  %s19_s22, 32, %s21_s24, [#allocation3]  }
   0x8   :  { %s363_s1 = smov [#allocation7]   ;;  %s53_s5 = sshll.u32 %s415_s3, 4  ;;  %s54_s5 = int_to_ptr.hbm [resolvable:$true] %s53_s5 }
   0x9   :  { %s41_s28 = sshll.u32 %s363_s1, 4  ;;  %s364_s6 = smov 128   ;;  %s42_s28 = int_to_ptr.vmem [resolvable:$true] %s41_s28 }
   0xa   :  { %s365_s0 = smov 8   ;;  %s366_s7 = smov [#allocation8]  }
   0xb   :  { %47 = dma.hbm_to_vmem [thread:$0]  %s40_s27, 4096, %s42_s28, [#allocation6], %s364_s6, %s364_s6, %s365_s0  }
   0xc   :  { %s55_s8 = sshll.u32 %s366_s7, 4  ;;  %s56_s8 = int_to_ptr.vmem [resolvable:$true] %s55_s8 }
   0xd   :  { %58 = dma.hbm_to_vmem [thread:$0]  %s54_s5, 128, %s56_s8, [#allocation9]  }
   0xe   :  { %353 = dma.done.wait [#allocation3], 32  }
   0xf   :  { %354 = vsyncadd [#allocation3], 4294967264 }
  0x10   :  { %355 = dma.done.wait [#allocation6], 4224  }
  0x11   :  { %356 = vsyncadd [#allocation6], 4294963072 }
  0x12   :  { %357 = dma.done.wait [#allocation9], 128  }
  0x13   :  { %358 = vsyncadd [#allocation9], 4294967168  ;;  %v367_v0 = vmov 0   ;;  %v368_v1 = vmov 2   ;;  %v75_v2 = vld [vmem:[#allocation2] sm:$0x3] }
  0x14   :  { %221 = vset.pattern.permute.xlu0 %v367_v0  ;;  %223 = vset.pattern.permute.xlu1 %v368_v1  ;;  %v129_v3 = vld [vmem:[#allocation7 + $0x78] sm:$0xff]  ;;  %v128_v4 = vld [vmem:[#allocation7 + $0x70] sm:$0xff]  ;;  %v127_v5 = vld [vmem:[#allocation7 + $0x68] sm:$0xff]  ;;  %v369_v8 = vmov 1   ;;  %v370_v9 = vmov 3   ;;  %s371_s2 = smov [#allocation10]  }
  0x15   :  { %82 = vperm.xlu0 %221, %v75_v2   ;;  %97 = vperm.xlu1 %223, %v75_v2   ;;  %v126_v6 = vld [vmem:[#allocation7 + $0x60] sm:$0xff]  ;;  %v125_v7 = vld [vmem:[#allocation7 + $0x58] sm:$0xff]  ;;  %v124_v10 = vld [vmem:[#allocation7 + $0x50] sm:$0xff]  ;;  %s196_s3 = sshll.u32 %s371_s2, 4  ;;  %s198_s11 = sshll.u32 %s416_s4, 4  ;;  %vm189_vm0 = vcmask 9216   ;;  %s197_s3 = int_to_ptr.vmem [resolvable:$true] %s196_s3  ;;  %s199_s11 = int_to_ptr.hbm [resolvable:$true] %s198_s11 }
  0x16   :  { %131 = vmatpush.msra.mxu0 %v129_v3  ;;  %v123_v11 = vld [vmem:[#allocation7 + $0x48] sm:$0xff]  ;;  %v122_v12 = vld [vmem:[#allocation7 + $0x40] sm:$0xff]  ;;  %v121_v13 = vld [vmem:[#allocation7 + $0x38] sm:$0xff] }
  0x17   :  { %v120_v14 = vld [vmem:[#allocation7 + $0x30] sm:$0xff]  ;;  %v119_v15 = vld [vmem:[#allocation7 + $0x28] sm:$0xff]  ;;  %v118_v16 = vld [vmem:[#allocation7 + $0x20] sm:$0xff] }
  0x18   :  { %132 = vmatpush.msra.mxu0 %v128_v4  ;;  %v117_v17 = vld [vmem:[#allocation7 + $0x18] sm:$0xff]  ;;  %v116_v18 = vld [vmem:[#allocation7 + $0x10] sm:$0xff]  ;;  %v115_v19 = vld [vmem:[#allocation7 + $0x8] sm:$0xff] }
  0x19   :  { %v114_v20 = vld [vmem:[#allocation7] sm:$0xff]  ;;  %v167_v21 = vld [vmem:[#allocation7 + $0xf8] sm:$0xff]  ;;  %v166_v22 = vld [vmem:[#allocation7 + $0xf0] sm:$0xff] }
  0x1a   :  { %133 = vmatpush.msra.mxu0 %v127_v5  ;;  %169 = vmatpush.msra.mxu1 %v167_v21  ;;  %v165_v23 = vld [vmem:[#allocation7 + $0xe8] sm:$0xff]  ;;  %v164_v24 = vld [vmem:[#allocation7 + $0xe0] sm:$0xff]  ;;  %v163_v25 = vld [vmem:[#allocation7 + $0xd8] sm:$0xff] }
  0x1b   :  { %v162_v26 = vld [vmem:[#allocation7 + $0xd0] sm:$0xff]  ;;  %v161_v29 = vld [vmem:[#allocation7 + $0xc8] sm:$0xff]  ;;  %v160_v30 = vld [vmem:[#allocation7 + $0xc0] sm:$0xff] }
  0x1c   :  { %134 = vmatpush.msra.mxu0 %v126_v6  ;;  %170 = vmatpush.msra.mxu1 %v166_v22  ;;  %v159_v31 = vld [vmem:[#allocation7 + $0xb8] sm:$0xff]  ;;  %v158_v34 = vld [vmem:[#allocation7 + $0xb0] sm:$0xff]  ;;  %v157_v37 = vld [vmem:[#allocation7 + $0xa8] sm:$0xff] }
  0x1d   :  { %222 = vset.pattern.permute.xlu0 %v369_v8  ;;  %224 = vset.pattern.permute.xlu1 %v370_v9  ;;  %v226_v32 = vld [vmem:[#allocation5] ss:$0 sm:$0xff]  ;;  %v228_v33 = vld [vmem:[#allocation5 + $0x1] ss:$0 sm:$0xff]  ;;  %v227_v35 = vld [vmem:[#allocation5 + $0x2] ss:$0 sm:$0xff] }
  0x1e   :  { %89 = vperm.xlu0 %222, %v75_v2   ;;  %105 = vperm.xlu1 %224, %v75_v2   ;;  %v229_v36 = vld [vmem:[#allocation5 + $0x3] ss:$0 sm:$0xff]  ;;  %v156_v42 = vld [vmem:[#allocation7 + $0xa0] sm:$0xff]  ;;  %v154_v52 = vld [vmem:[#allocation7 + $0x90] sm:$0xff] }
  0x1f   :  { %135 = vmatpush.msra.mxu0 %v125_v7  ;;  %171 = vmatpush.msra.mxu1 %v165_v23  ;;  %v155_v46 = vld [vmem:[#allocation7 + $0x98] sm:$0xff]  ;;  %v230_v48 = vld [vmem:[#allocation8] ss:$0 sm:$0xff]  ;;  %v153_v53 = vld [vmem:[#allocation7 + $0x88] sm:$0xff] }
  0x20   :  { %v152_v54 = vld [vmem:[#allocation7 + $0x80] sm:$0xff] }
  0x21   :  { %136 = vmatpush.msra.mxu0 %v124_v10  ;;  %172 = vmatpush.msra.mxu1 %v164_v24  ;;  %v231_v55 = vld [vmem:[#allocation8 + $0x1] ss:$0 sm:$0xff]  ;;  %v232_v59 = vld [vmem:[#allocation8 + $0x2] ss:$0 sm:$0xff] }
  0x23   :  { %137 = vmatpush.msra.mxu0 %v123_v11  ;;  %173 = vmatpush.msra.mxu1 %v163_v25 }
  0x25   :  { %138 = vmatpush.msra.mxu0 %v122_v12  ;;  %174 = vmatpush.msra.mxu1 %v162_v26 }
  0x26   :  { %225 = vset.pattern.permute.xlu0 %v370_v9 }
  0x27   :  { %139 = vmatpush.msra.mxu0 %v121_v13  ;;  %175 = vmatpush.msra.mxu1 %v161_v29 }
  0x29   :  { %140 = vmatpush.msra.mxu0 %v120_v14  ;;  %176 = vmatpush.msra.mxu1 %v160_v30 }
  0x2b   :  { %141 = vmatpush.msra.mxu0 %v119_v15  ;;  %177 = vmatpush.msra.mxu1 %v159_v31 }
  0x2d   :  { %142 = vmatpush.msra.mxu0 %v118_v16  ;;  %178 = vmatpush.msra.mxu1 %v158_v34 }
  0x2f   :  { %143 = vmatpush.msra.mxu0 %v117_v17  ;;  %179 = vmatpush.msra.mxu1 %v157_v37 }
  0x31   :  { %144 = vmatpush.msra.mxu0 %v116_v18  ;;  %180 = vmatpush.msra.mxu1 %v156_v42 }
  0x33   :  { %145 = vmatpush.msra.mxu0 %v115_v19  ;;  %181 = vmatpush.msra.mxu1 %v155_v46 }
  0x35   :  { %146 = vmatpush.msra.mxu0 %v114_v20  ;;  %182 = vmatpush.msra.mxu1 %v154_v52 }
  0x37   :  { %183 = vmatpush.msra.mxu1 %v153_v53 }
  0x39   :  { %184 = vmatpush.msra.mxu1 %v152_v54 }
  0x87   :  { %v83_v27 = vpop.permute.xlu0 %82  ;;  %v98_v28 = vpop.permute.xlu1 %97 }
  0x88   :  { %v86_v40 = vmul.f32 %v226_v32, %v83_v27  ;;  %v101_v43 = vmul.f32 %v227_v35, %v98_v28 }
  0x90   :  { %v90_v38 = vpop.permute.xlu0 %89  ;;  %v106_v39 = vpop.permute.xlu1 %105 }
  0x91   :  { %v93_v41 = vmul.f32 %v228_v33, %v90_v38  ;;  %v109_v45 = vmul.f32 %v229_v36, %v106_v39 }
  0x93   :  { %v94_v44 = vadd.f32 %v93_v41, %v86_v40 }
  0x95   :  { %v102_v47 = vadd.f32 %v101_v43, %v94_v44 }
  0x97   :  { %v110_v49 = vadd.f32 %v109_v45, %v102_v47 }
  0x99   :  { %v112_v50 = vadd.f32 %v230_v48, %v110_v49 }
  0x9b   :  { %v113_v51 = vmax.f32 %v112_v50, 0.0 }
  0x9d   :  { %147 = vmatmul.f32.vlgmr.msra.gmra.mxu0 %v113_v51 }
 0x11a   :  { %v148_v56 = vpop.f32.mrf.mxu0 }
 0x11b   :  { %v149_v57 = vadd.f32 %v231_v55, %v148_v56 }
 0x11d   :  { %v151_v58 = vmax.f32 %v149_v57, 0.0 }
 0x11f   :  { %185 = vmatmul.f32.vlgmr.msra.gmra.mxu1 %v151_v58 }
 0x19c   :  { %v186_v60 = vpop.f32.mrf.mxu1 }
 0x19d   :  { %v187_v61 = vadd.f32 %v232_v59, %v186_v60 }
 0x19f   :  { %190 = vst.msk [vmem:[#allocation10] sm:$0x3] %vm189_vm0, %v187_v61 }
 0x1a0   :  { %201 = dma.vmem_to_hbm [thread:$0]  %s197_s3, 32, %s199_s11, [#allocation4]  }
 0x1a1   :  { %359 = dma.done.wait [#allocation4], 32  }
 0x1a2   :  { %360 = vsyncadd [#allocation4], 4294967264 }
 0x1a3   :  { %206 = vsyncpa [#allocation3], 1 }
 0x1a4   :  { %207 = vsyncpa [#allocation6], 1 }
 0x1a5   :  { %208 = vsyncpa [#allocation9], 1 }
 0x1a6   :  { %209 = vsyncpa [#allocation4], 1 }

</bundles_post_ra>
